<compile_context>
chip_gen: v6e
topology: v6e:2x2x1
jax: 0.10.0
libtpu: 0.0.40
codegen_flags: <defaults>
</compile_context>

<pallas_src>
import itertools
import numpy as np

import jax
import jax.numpy as jnp
from jax.experimental import pallas as pl
from jax.experimental.pallas import tpu as pltpu


# ----------------------------------------------------------------------------
# Parameter setup (replicates MuxoutTranspose.__init__'s probe through Muxout).
# ----------------------------------------------------------------------------
def compute_iperm(stride):
    """iperm[c, k]: sub-position q = sh*Sw + sw of the un-shuffled input that
    feeds output slot k for permutation pair c (pmode='all')."""
    Sh, Sw = stride
    # multiset_permutations(arange(n)) is lexicographic == itertools order.
    perm_v = list(itertools.permutations(range(Sh)))
    perm_h = list(itertools.permutations(range(Sw)))
    fwd = []
    for i in perm_v:
        for j in perm_h:
            m = (np.asarray(i)[:, None] * Sw + np.asarray(j)[None, :]).reshape(-1)
            fwd.append(m)
    fwd = np.stack(fwd, axis=0)                       # (Gout, Gin)
    return np.argsort(fwd, axis=1).astype(np.int32)


# ----------------------------------------------------------------------------
# Tiling helpers.
# ----------------------------------------------------------------------------
_TILE_BUDGET = 24 << 20     # per-step working-set target (fits every generation)
_VMEM_CAP = 48 << 20        # never request more (v7x physical VMEM = 64 MiB/TC)


def _pick_chunk(W):
    """Output-lane chunk width for the one-hot column selector."""
    if W % 128 == 0:
        return 128
    if W <= 256:
        return W
    for d in range(256, 63, -1):
        if W % d == 0:
            return d
    return W          # rare ragged fallback: single full-width chunk


def _pick_th(H, quantum, budget, bytes_fn):
    """Largest th that divides H, is a multiple of `quantum` (or == H), and
    keeps the per-step working set under `budget`."""
    cands = {H}
    d = quantum
    while d <= H:
        if H % d == 0:
            cands.add(d)
        d += quantum
    cands = sorted(cands, reverse=True)
    for th in cands:
        if bytes_fn(th) <= budget:
            return th
    return cands[-1]


# ----------------------------------------------------------------------------
# Pallas kernel
# ----------------------------------------------------------------------------
def _make_kernel(Gout, Gin, Sh, Sw, inW, W, th, CH, n_ch, norm, cast_rows,
                 use_sel):
    f32 = jnp.float32
    inv_gout = 1.0 / float(Gout)

    def kernel(kinv_ref, *refs):
        # kinv_ref : SMEM (Gout, Gin) int32  (scalar prefetch)
        # csel_ref : VMEM (Sw*CH, Sw*CH) one-hot column selector (if use_sel)
        # x_ref    : (th, Sh*inW)  rows h of the (b, c, g) plane, Sh input rows
        #            per output row concatenated along lanes
        # o_ref    : (Gin, th, W)  output block (written at the last c step)
        # acc_ref  : (Gin, th, W)  f32 accumulator scratch (persists across c)
        if use_sel:
            csel_ref, x_ref, o_ref, acc_ref = refs
        else:
            x_ref, o_ref, acc_ref = refs
        c = pl.program_id(3)

        @pl.when(c == 0)
        def _init():
            acc_ref[...] = jnp.zeros_like(acc_ref)

        csel = csel_ref[...] if use_sel else None

        for sh in range(Sh):
            base = sh * inW                                  # contiguous slab
            for j in range(n_ch):
                lo = j * CH
                seg = x_ref[:, base + j * Sw * CH: base + (j + 1) * Sw * CH]
                if use_sel:
                    if cast_rows:
                        seg = seg.astype(f32)
                    # One MXU matmul de-interleaves all Sw sub-columns of this
                    # 128-lane output chunk; accumulation is f32 on the MXU.
                    cols = jnp.dot(seg, csel,
                                   preferred_element_type=f32)   # (th, Sw*CH)
                else:
                    cols = seg.astype(f32)
                for sw in range(Sw):
                    # Output slot fed by sub-position (sh, sw) for this c.
                    k = kinv_ref[c, sh * Sw + sw]
                    acc_ref[k, :, lo:lo + CH] += cols[:, sw * CH:(sw + 1) * CH]

        @pl.when(c == Gout - 1)
        def _fin():
            for kk in range(Gin):
                res = acc_ref[kk]
                if norm:
                    res = res * inv_gout
                o_ref[kk] = res.astype(o_ref.dtype)

    return kernel


def muxout_transpose(x, stride, norm=False):
    """Pallas equivalent of MuxoutTranspose(stride, norm, pmode='all').forward(x).

    x: (B, C, inH, inW) NCHW, C % Gout == 0, inH % Sh == 0, inW % Sw == 0.
    Returns: (B, Ng*Gin, inH//Sh, inW//Sw), Ng = C // Gout.
    """
    Sh, Sw = stride
    iperm = compute_iperm(stride)                         # (Gout, Gin)
    kinv = np.argsort(iperm, axis=1).astype(np.int32)     # (c, sh*Sw+sw) -> k
    Gout, Gin = iperm.shape
    B, C, inH, inW = x.shape
    assert C % Gout == 0, f"Channels={C} must be divisible by Gout={Gout}"
    assert inH % Sh == 0 and inW % Sw == 0
    Ng = C // Gout
    H, W = inH // Sh, inW // Sw

    # Selector dtype: bf16 stays bf16 (native MXU rate, one-hot select exact);
    # everything else goes through f32.
    if x.dtype == jnp.bfloat16:
        sel_dtype, cast_rows = jnp.bfloat16, False
    elif x.dtype == jnp.float32:
        sel_dtype, cast_rows = jnp.float32, False
    else:
        sel_dtype, cast_rows = jnp.float32, True
    x_item = int(np.dtype(x.dtype).itemsize)
    sel_item = int(np.dtype(sel_dtype).itemsize)

    use_sel = Sw > 1
    CH = _pick_chunk(W) if use_sel else W
    n_ch = W // CH

    # dtype-aware sublane quantum (8 f32 / 16 bf16 / 32 int8).
    quantum = 8 * max(1, 4 // x_item)

    def est_bytes(th):
        xblk = 2 * th * Sh * inW * x_item                 # double-buffered input
        oblk = 2 * Gin * th * W * x_item                  # double-buffered output
        acc = Gin * th * W * 4                            # f32 scratch
        sel = (2 * (Sw * CH) * (Sw * CH) * sel_item) if use_sel else 0
        tmp = 2 * th * Sw * CH * 4 + th * Sw * CH * x_item  # in-kernel temps
        return xblk + oblk + acc + sel + tmp

    th = _pick_th(H, quantum, _TILE_BUDGET, est_bytes)
    est = est_bytes(th)
    vmem_limit = None
    if est > (10 << 20):
        vmem_limit = min(int(est * 1.4) + (2 << 20), _VMEM_CAP)

    # Constant 128-lane-chunk one-hot column selector:
    #   csel[lw*Sw + sw, sw*CH + lw] = 1  (identical for every chunk).
    call_args = [jnp.asarray(kinv)]
    in_specs = []
    if use_sel:
        csel_np = np.zeros((Sw * CH, Sw * CH), dtype=np.float32)
        for lw in range(CH):
            for sw in range(Sw):
                csel_np[lw * Sw + sw, sw * CH + lw] = 1.0
        csel = jnp.asarray(csel_np, dtype=sel_dtype)
        in_specs.append(
            pl.BlockSpec((Sw * CH, Sw * CH), lambda b, g, i, c, kv: (0, 0)))
        call_args.append(csel)

    # Free view: channel = c*Ng + g, and inH split as (H, Sh) folded into the
    # lane dim -> row h holds the Sh input rows h*Sh+sh back to back.
    xr = x.reshape(B, Gout, Ng, H, Sh * inW)
    in_specs.append(
        pl.BlockSpec((None, None, None, th, Sh * inW),
                     lambda b, g, i, c, kv: (b, c, g, i, 0)))
    call_args.append(xr)

    out_spec = pl.BlockSpec((None, None, Gin, th, W),
                            lambda b, g, i, c, kv: (b, g, 0, i, 0))

    kernel = _make_kernel(Gout, Gin, Sh, Sw, inW, W, th, CH, n_ch, norm,
                          cast_rows, use_sel)

    matmul_flops = (2 * B * Ng * Gout * Sh * Sw * Sw * H * W * CH
                    if use_sel else 0)
    add_flops = B * Ng * Gout * Gin * H * W
    bytes_accessed = (B * C * inH * inW + B * Ng * Gin * H * W) * x_item
    cost = pl.CostEstimate(flops=int(matmul_flops + add_flops),
                           transcendentals=0,
                           bytes_accessed=int(bytes_accessed))

    grid = (B, Ng, H // th, Gout)
    out = pl.pallas_call(
        kernel,
        out_shape=jax.ShapeDtypeStruct((B, Ng, Gin, H, W), x.dtype),
        grid_spec=pltpu.PrefetchScalarGridSpec(
            num_scalar_prefetch=1,
            grid=grid,
            in_specs=in_specs,
            out_specs=out_spec,
            scratch_shapes=[pltpu.VMEM((Gin, th, W), jnp.float32)],
        ),
        compiler_params=pltpu.CompilerParams(
            dimension_semantics=("parallel", "parallel", "parallel",
                                 "arbitrary"),
            vmem_limit_bytes=vmem_limit,
        ),
        cost_estimate=cost,
    )(*call_args)

    # channel order = g*Gin + k, exactly matching PyTorch's torch.cat over g.
    return out.reshape(B, Ng * Gin, H, W)


# ----------------------------------------------------------------------------
# Pure-numpy reference (mirrors the PyTorch forward) for self-check.
# ----------------------------------------------------------------------------
def reference_forward(x, stride, norm=False):
    Sh, Sw = stride
    iperm = compute_iperm(stride)
    Gout, Gin = iperm.shape
    B, C, inH, inW = x.shape
    Ng = C // Gout
    H, W = inH // Sh, inW // Sw
    y = (x.reshape(B, Gout, Ng, H, Sh, W, Sw)
           .transpose(0, 1, 2, 4, 6, 3, 5)
           .reshape(B, Gout, Ng, Gin, H, W))
    out = np.zeros((B, Ng * Gin, H, W), dtype=x.dtype)
    for c in range(Gout):
        terms = [y[:, c, g][:, iperm[c]] for g in range(Ng)]
        out = out + np.concatenate(terms, axis=1)
    if norm:
        out = out / Gout
    return out


if __name__ == "__main__":
    key = jax.random.PRNGKey(0)

    # Primary case: stride (2,2) -> Gin = 4, Gout = 2!*2! = 4.
    stride = (2, 2)
    Gout = compute_iperm(stride).shape[0]
    B, Ng = 2, 2
    C = Gout * Ng                        # 8 input channels
    inH = inW = 16
    x = jax.random.normal(key, (B, C, inH, inW), dtype=jnp.float32)

    out = jax.block_until_ready(muxout_transpose(x, stride, norm=False))
    ref = reference_forward(np.asarray(x), stride, norm=False)
    assert out.shape == ref.shape, (out.shape, ref.shape)
    np.testing.assert_allclose(np.asarray(out), ref, rtol=1e-5, atol=1e-5)

    # Normalized path (1/Gout applied at finalize).
    out_n = jax.block_until_ready(muxout_transpose(x, stride, norm=True))
    ref_n = reference_forward(np.asarray(x), stride, norm=True)
    np.testing.assert_allclose(np.asarray(out_n), ref_n, rtol=1e-5, atol=1e-5)

    # Asymmetric stride: (2,3) -> Gin = 6, Gout = 2!*3! = 12.
    stride2 = (2, 3)
    Gout2 = compute_iperm(stride2).shape[0]
    x2 = jax.random.normal(jax.random.PRNGKey(1), (1, Gout2, 16, 12),
                           dtype=jnp.float32)
    out2 = jax.block_until_ready(muxout_transpose(x2, stride2, norm=False))
    ref2 = reference_forward(np.asarray(x2), stride2, norm=False)
    np.testing.assert_allclose(np.asarray(out2), ref2, rtol=1e-5, atol=1e-5)

    print("KERNEL_OK")
</pallas_src>

<mosaic_0001>
module attributes {stable_mosaic.version = 11 : i64} {
  func.func @kernel(%arg0: i32, %arg1: i32, %arg2: i32, %arg3: i32, %arg4: memref<4x4xi32, #tpu.memory_space<smem>>, %arg5: memref<16x16xf32, #tpu.memory_space<vmem>>, %arg6: memref<1x1x1x8x32xf32, #tpu.memory_space<vmem>>, %arg7: memref<1x1x4x8x8xf32, #tpu.memory_space<vmem>>, %arg8: memref<4x8x8xf32, #tpu.memory_space<vmem>>) attributes {dimension_semantics = [#tpu.dimension_semantics<parallel>, #tpu.dimension_semantics<parallel>, #tpu.dimension_semantics<parallel>, #tpu.dimension_semantics<arbitrary>], iteration_bounds = array<i64: 2, 2, 1, 4>, scalar_prefetch = 1 : i64, scratch_operands = 1 : i64, tpu.core_type = #tpu.core_type<tc>, window_params = [{pipeline_mode = #tpu.pipeline_mode<synchronous>, transform_indices = @transform_0, window_bounds = array<i64: 16, 16>}, {transform_indices = @transform_1, window_bounds = array<i64: 1, 1, 1, 8, 32>}, {transform_indices = @transform_2, window_bounds = array<i64: 1, 1, 4, 8, 8>}]} {
    %c0_i32 = arith.constant 0 : i32
    %0 = arith.cmpi eq, %arg3, %c0_i32 : i32
    %1 = arith.extui %0 : i1 to i32
    %c0_i32_0 = arith.constant 0 : i32
    %2 = arith.cmpi ne, %1, %c0_i32_0 : i32
    scf.if %2 {
      %cst_30 = arith.constant 0.000000e+00 : f32
      %57 = vector.broadcast %cst_30 : f32 to vector<4x8x8xf32>
      %c0_31 = arith.constant 0 : index
      %c0_32 = arith.constant 0 : index
      %c0_33 = arith.constant 0 : index
      %58 = vector.load %arg8[%c0_31, %c0_32, %c0_33] : memref<4x8x8xf32, #tpu.memory_space<vmem>>, vector<4x8x8xf32>
      tpu.vector_store %arg8[%c0_31, %c0_32, %c0_33], %57 {strides = array<i32>} : memref<4x8x8xf32, #tpu.memory_space<vmem>>, vector<4x8x8xf32>,
    } else {
    }
    %c0 = arith.constant 0 : index
    %c0_1 = arith.constant 0 : index
    %3 = vector.load %arg5[%c0, %c0_1] : memref<16x16xf32, #tpu.memory_space<vmem>>, vector<16x16xf32>
    %c0_2 = arith.constant 0 : index
    %c0_3 = arith.constant 0 : index
    %c0_4 = arith.constant 0 : index
    %c0_5 = arith.constant 0 : index
    %c0_6 = arith.constant 0 : index
    %4 = vector.load %arg6[%c0_2, %c0_3, %c0_4, %c0_5, %c0_6] : memref<1x1x1x8x32xf32, #tpu.memory_space<vmem>>, vector<1x1x1x8x16xf32>
    %5 = vector.shape_cast %4 : vector<1x1x1x8x16xf32> to vector<8x16xf32>
    %cst = arith.constant dense<0.000000e+00> : vector<8x16xf32>
    %6 = tpu.matmul %5, %3, %cst {dimension_numbers = #tpu.dot_dimension_numbers<[1], [0], [0], [1], [0, 0, 1, 1], [], []>} : vector<8x16xf32>, vector<16x16xf32>, vector<8x16xf32> -> vector<8x16xf32>
    %7 = arith.index_cast %arg3 : i32 to index
    %c0_7 = arith.constant 0 : index
    %8 = memref.load %arg4[%7, %c0_7] : memref<4x4xi32, #tpu.memory_space<smem>>
    %9 = arith.index_cast %8 : i32 to index
    %c0_8 = arith.constant 0 : index
    %c0_9 = arith.constant 0 : index
    %10 = vector.load %arg8[%9, %c0_8, %c0_9] : memref<4x8x8xf32, #tpu.memory_space<vmem>>, vector<1x8x8xf32>
    %11 = vector.shape_cast %10 : vector<1x8x8xf32> to vector<8x8xf32>
    %12 = vector.extract_strided_slice %6 {offsets = [0, 0], sizes = [8, 8], strides = [1, 1]} : vector<8x16xf32> to vector<8x8xf32>
    %13 = arith.addf %11, %12 : vector<8x8xf32>
    %14 = arith.index_cast %8 : i32 to index
    %c0_10 = arith.constant 0 : index
    %c0_11 = arith.constant 0 : index
    %15 = vector.load %arg8[%14, %c0_10, %c0_11] : memref<4x8x8xf32, #tpu.memory_space<vmem>>, vector<1x8x8xf32>
    %16 = vector.shape_cast %15 : vector<1x8x8xf32> to vector<8x8xf32>
    %17 = vector.shape_cast %13 : vector<8x8xf32> to vector<1x8x8xf32>
    tpu.vector_store %arg8[%14, %c0_10, %c0_11], %17 {strides = array<i32>} : memref<4x8x8xf32, #tpu.memory_space<vmem>>, vector<1x8x8xf32>,
    %18 = arith.index_cast %arg3 : i32 to index
    %c1 = arith.constant 1 : index
    %19 = memref.load %arg4[%18, %c1] : memref<4x4xi32, #tpu.memory_space<smem>>
    %20 = arith.index_cast %19 : i32 to index
    %c0_12 = arith.constant 0 : index
    %c0_13 = arith.constant 0 : index
    %21 = vector.load %arg8[%20, %c0_12, %c0_13] : memref<4x8x8xf32, #tpu.memory_space<vmem>>, vector<1x8x8xf32>
    %22 = vector.shape_cast %21 : vector<1x8x8xf32> to vector<8x8xf32>
    %23 = vector.extract_strided_slice %6 {offsets = [0, 8], sizes = [8, 8], strides = [1, 1]} : vector<8x16xf32> to vector<8x8xf32>
    %24 = arith.addf %22, %23 : vector<8x8xf32>
    %25 = arith.index_cast %19 : i32 to index
    %c0_14 = arith.constant 0 : index
    %c0_15 = arith.constant 0 : index
    %26 = vector.load %arg8[%25, %c0_14, %c0_15] : memref<4x8x8xf32, #tpu.memory_space<vmem>>, vector<1x8x8xf32>
    %27 = vector.shape_cast %26 : vector<1x8x8xf32> to vector<8x8xf32>
    %28 = vector.shape_cast %24 : vector<8x8xf32> to vector<1x8x8xf32>
    tpu.vector_store %arg8[%25, %c0_14, %c0_15], %28 {strides = array<i32>} : memref<4x8x8xf32, #tpu.memory_space<vmem>>, vector<1x8x8xf32>,
    %c0_16 = arith.constant 0 : index
    %c0_17 = arith.constant 0 : index
    %c0_18 = arith.constant 0 : index
    %c0_19 = arith.constant 0 : index
    %c16 = arith.constant 16 : index
    %29 = vector.load %arg6[%c0_16, %c0_17, %c0_18, %c0_19, %c16] : memref<1x1x1x8x32xf32, #tpu.memory_space<vmem>>, vector<1x1x1x8x16xf32>
    %30 = vector.shape_cast %29 : vector<1x1x1x8x16xf32> to vector<8x16xf32>
    %cst_20 = arith.constant dense<0.000000e+00> : vector<8x16xf32>
    %31 = tpu.matmul %30, %3, %cst_20 {dimension_numbers = #tpu.dot_dimension_numbers<[1], [0], [0], [1], [0, 0, 1, 1], [], []>} : vector<8x16xf32>, vector<16x16xf32>, vector<8x16xf32> -> vector<8x16xf32>
    %32 = arith.index_cast %arg3 : i32 to index
    %c2 = arith.constant 2 : index
    %33 = memref.load %arg4[%32, %c2] : memref<4x4xi32, #tpu.memory_space<smem>>
    %34 = arith.index_cast %33 : i32 to index
    %c0_21 = arith.constant 0 : index
    %c0_22 = arith.constant 0 : index
    %35 = vector.load %arg8[%34, %c0_21, %c0_22] : memref<4x8x8xf32, #tpu.memory_space<vmem>>, vector<1x8x8xf32>
    %36 = vector.shape_cast %35 : vector<1x8x8xf32> to vector<8x8xf32>
    %37 = vector.extract_strided_slice %31 {offsets = [0, 0], sizes = [8, 8], strides = [1, 1]} : vector<8x16xf32> to vector<8x8xf32>
    %38 = arith.addf %36, %37 : vector<8x8xf32>
    %39 = arith.index_cast %33 : i32 to index
    %c0_23 = arith.constant 0 : index
    %c0_24 = arith.constant 0 : index
    %40 = vector.load %arg8[%39, %c0_23, %c0_24] : memref<4x8x8xf32, #tpu.memory_space<vmem>>, vector<1x8x8xf32>
    %41 = vector.shape_cast %40 : vector<1x8x8xf32> to vector<8x8xf32>
    %42 = vector.shape_cast %38 : vector<8x8xf32> to vector<1x8x8xf32>
    tpu.vector_store %arg8[%39, %c0_23, %c0_24], %42 {strides = array<i32>} : memref<4x8x8xf32, #tpu.memory_space<vmem>>, vector<1x8x8xf32>,
    %43 = arith.index_cast %arg3 : i32 to index
    %c3 = arith.constant 3 : index
    %44 = memref.load %arg4[%43, %c3] : memref<4x4xi32, #tpu.memory_space<smem>>
    %45 = arith.index_cast %44 : i32 to index
    %c0_25 = arith.constant 0 : index
    %c0_26 = arith.constant 0 : index
    %46 = vector.load %arg8[%45, %c0_25, %c0_26] : memref<4x8x8xf32, #tpu.memory_space<vmem>>, vector<1x8x8xf32>
    %47 = vector.shape_cast %46 : vector<1x8x8xf32> to vector<8x8xf32>
    %48 = vector.extract_strided_slice %31 {offsets = [0, 8], sizes = [8, 8], strides = [1, 1]} : vector<8x16xf32> to vector<8x8xf32>
    %49 = arith.addf %47, %48 : vector<8x8xf32>
    %50 = arith.index_cast %44 : i32 to index
    %c0_27 = arith.constant 0 : index
    %c0_28 = arith.constant 0 : index
    %51 = vector.load %arg8[%50, %c0_27, %c0_28] : memref<4x8x8xf32, #tpu.memory_space<vmem>>, vector<1x8x8xf32>
    %52 = vector.shape_cast %51 : vector<1x8x8xf32> to vector<8x8xf32>
    %53 = vector.shape_cast %49 : vector<8x8xf32> to vector<1x8x8xf32>
    tpu.vector_store %arg8[%50, %c0_27, %c0_28], %53 {strides = array<i32>} : memref<4x8x8xf32, #tpu.memory_space<vmem>>, vector<1x8x8xf32>,
    %c3_i32 = arith.constant 3 : i32
    %54 = arith.cmpi eq, %arg3, %c3_i32 : i32
    %55 = arith.extui %54 : i1 to i32
    %c0_i32_29 = arith.constant 0 : i32
    %56 = arith.cmpi ne, %55, %c0_i32_29 : i32
    scf.if %56 {
      %c0_30 = arith.constant 0 : index
      %c0_31 = arith.constant 0 : index
      %c0_32 = arith.constant 0 : index
      %57 = vector.load %arg8[%c0_30, %c0_31, %c0_32] : memref<4x8x8xf32, #tpu.memory_space<vmem>>, vector<1x8x8xf32>
      %58 = vector.shape_cast %57 : vector<1x8x8xf32> to vector<8x8xf32>
      %c0_33 = arith.constant 0 : index
      %c0_34 = arith.constant 0 : index
      %c0_35 = arith.constant 0 : index
      %c0_36 = arith.constant 0 : index
      %c0_37 = arith.constant 0 : index
      %59 = vector.load %arg7[%c0_33, %c0_34, %c0_35, %c0_36, %c0_37] : memref<1x1x4x8x8xf32, #tpu.memory_space<vmem>>, vector<1x1x1x8x8xf32>
      %60 = vector.shape_cast %59 : vector<1x1x1x8x8xf32> to vector<8x8xf32>
      %61 = vector.shape_cast %58 : vector<8x8xf32> to vector<1x1x1x8x8xf32>
      tpu.vector_store %arg7[%c0_33, %c0_34, %c0_35, %c0_36, %c0_37], %61 {strides = array<i32>} : memref<1x1x4x8x8xf32, #tpu.memory_space<vmem>>, vector<1x1x1x8x8xf32>,
      %c1_38 = arith.constant 1 : index
      %c0_39 = arith.constant 0 : index
      %c0_40 = arith.constant 0 : index
      %62 = vector.load %arg8[%c1_38, %c0_39, %c0_40] : memref<4x8x8xf32, #tpu.memory_space<vmem>>, vector<1x8x8xf32>
      %63 = vector.shape_cast %62 : vector<1x8x8xf32> to vector<8x8xf32>
      %c0_41 = arith.constant 0 : index
      %c0_42 = arith.constant 0 : index
      %c1_43 = arith.constant 1 : index
      %c0_44 = arith.constant 0 : index
      %c0_45 = arith.constant 0 : index
      %64 = vector.load %arg7[%c0_41, %c0_42, %c1_43, %c0_44, %c0_45] : memref<1x1x4x8x8xf32, #tpu.memory_space<vmem>>, vector<1x1x1x8x8xf32>
      %65 = vector.shape_cast %64 : vector<1x1x1x8x8xf32> to vector<8x8xf32>
      %66 = vector.shape_cast %63 : vector<8x8xf32> to vector<1x1x1x8x8xf32>
      tpu.vector_store %arg7[%c0_41, %c0_42, %c1_43, %c0_44, %c0_45], %66 {strides = array<i32>} : memref<1x1x4x8x8xf32, #tpu.memory_space<vmem>>, vector<1x1x1x8x8xf32>,
      %c2_46 = arith.constant 2 : index
      %c0_47 = arith.constant 0 : index
      %c0_48 = arith.constant 0 : index
      %67 = vector.load %arg8[%c2_46, %c0_47, %c0_48] : memref<4x8x8xf32, #tpu.memory_space<vmem>>, vector<1x8x8xf32>
      %68 = vector.shape_cast %67 : vector<1x8x8xf32> to vector<8x8xf32>
      %c0_49 = arith.constant 0 : index
      %c0_50 = arith.constant 0 : index
      %c2_51 = arith.constant 2 : index
      %c0_52 = arith.constant 0 : index
      %c0_53 = arith.constant 0 : index
      %69 = vector.load %arg7[%c0_49, %c0_50, %c2_51, %c0_52, %c0_53] : memref<1x1x4x8x8xf32, #tpu.memory_space<vmem>>, vector<1x1x1x8x8xf32>
      %70 = vector.shape_cast %69 : vector<1x1x1x8x8xf32> to vector<8x8xf32>
      %71 = vector.shape_cast %68 : vector<8x8xf32> to vector<1x1x1x8x8xf32>
      tpu.vector_store %arg7[%c0_49, %c0_50, %c2_51, %c0_52, %c0_53], %71 {strides = array<i32>} : memref<1x1x4x8x8xf32, #tpu.memory_space<vmem>>, vector<1x1x1x8x8xf32>,
      %c3_54 = arith.constant 3 : index
      %c0_55 = arith.constant 0 : index
      %c0_56 = arith.constant 0 : index
      %72 = vector.load %arg8[%c3_54, %c0_55, %c0_56] : memref<4x8x8xf32, #tpu.memory_space<vmem>>, vector<1x8x8xf32>
      %73 = vector.shape_cast %72 : vector<1x8x8xf32> to vector<8x8xf32>
      %c0_57 = arith.constant 0 : index
      %c0_58 = arith.constant 0 : index
      %c3_59 = arith.constant 3 : index
      %c0_60 = arith.constant 0 : index
      %c0_61 = arith.constant 0 : index
      %74 = vector.load %arg7[%c0_57, %c0_58, %c3_59, %c0_60, %c0_61] : memref<1x1x4x8x8xf32, #tpu.memory_space<vmem>>, vector<1x1x1x8x8xf32>
      %75 = vector.shape_cast %74 : vector<1x1x1x8x8xf32> to vector<8x8xf32>
      %76 = vector.shape_cast %73 : vector<8x8xf32> to vector<1x1x1x8x8xf32>
      tpu.vector_store %arg7[%c0_57, %c0_58, %c3_59, %c0_60, %c0_61], %76 {strides = array<i32>} : memref<1x1x4x8x8xf32, #tpu.memory_space<vmem>>, vector<1x1x1x8x8xf32>,
    } else {
    }
    return
  }
  func.func @transform_0(%arg0: i32, %arg1: i32, %arg2: i32, %arg3: i32, %arg4: memref<4x4xi32, #tpu.memory_space<smem>>) -> (i32, i32) {
    %c0_i32 = arith.constant 0 : i32
    %c0_i32_0 = arith.constant 0 : i32
    %c0_i32_1 = arith.constant 0 : i32
    return %c0_i32, %c0_i32_0 : i32, i32
  }
  func.func @transform_1(%arg0: i32, %arg1: i32, %arg2: i32, %arg3: i32, %arg4: memref<4x4xi32, #tpu.memory_space<smem>>) -> (i32, i32, i32, i32, i32) {
    %c0_i32 = arith.constant 0 : i32
    %c0_i32_0 = arith.constant 0 : i32
    return %arg0, %arg3, %arg1, %arg2, %c0_i32 : i32, i32, i32, i32, i32
  }
  func.func @transform_2(%arg0: i32, %arg1: i32, %arg2: i32, %arg3: i32, %arg4: memref<4x4xi32, #tpu.memory_space<smem>>) -> (i32, i32, i32, i32, i32) {
    %c0_i32 = arith.constant 0 : i32
    %c0_i32_0 = arith.constant 0 : i32
    %c0_i32_1 = arith.constant 0 : i32
    return %arg0, %arg1, %c0_i32, %arg2, %c0_i32_0 : i32, i32, i32, i32, i32
  }
}

</mosaic_0001>

<bundles_post_ra>
// kernel: tpu_custom_call.1
= control target key start
LH: loop header
LB: loop body
LE: loop exit
PB: predicated region body
PF: predicated region fallthrough
CT: control target
= control target key end

     0   :  { %s972_s12 = smov [#allocation4]   ;;  %s1282_s0 = inlined_call_operand.hbm [shape: s32[4,4], index: 0, kind: input, shape index: {}]   ;;  %s1283_s1 = inlined_call_operand.hbm [shape: f32[16,16], index: 1, kind: input, shape index: {}]   ;;  %s1284_s2 = inlined_call_operand.hbm [shape: f32[2,4,2,8,32], index: 2, kind: input, shape index: {}]   ;;  %s1285_s3 = inlined_call_operand.hbm [shape: f32[2,2,4,8,8], index: 3, kind: output, shape index: {}]  }
   0x1   :  { %1301 = sst [smem:[#allocation27_spill]] %s1283_s1 }
   0x2   :  { %1302 = sst [smem:[#allocation28_spill]] %s1285_s3 }
   0x3   :  { %9 = dma.hbm_to_smem %s1282_s0, 64, %s972_s12, [#allocation3] }
   0x4   :  { %906 = dma.done.wait [#allocation3], 64 }
   0x5   :  { %907 = vsyncadd [#allocation3], 4294967232 }
   0x6   :  { %11 = sfence }
   0x7   :  { %12 = vsyncpa [#allocation6], 0 }
   0x8   :  { %13 = vsyncpa [#allocation9], 0 }
   0x9   :  { %15 = vsyncpa [#allocation9 + $0x1], 0 }
   0xa   :  { %16 = vsyncpa [#allocation7], 0 }
   0xb   :  { %18 = vsyncpa [#allocation7 + $0x1], 0  ;;  %s1008_s15 = smov 0   ;;  %s1010_s16 = smov 0  }
   0xc   :  { %s1012_s17 = smov 0   ;;  %s1014_s18 = smov 0  }
   0xd   :  { %s1016_s19 = smov 0   ;;  %s1018_s20 = smov 0  }
   0xe   :  { %s1020_s0 = smov 0   ;;  %s1022_s21 = smov 0  }
   0xf   :  { %s1024_s22 = smov 0   ;;  %s1026_s23 = smov 0  }
  0x10   :  { %s1028_s24 = smov 0   ;;  %s1030_s25 = smov 0  }
  0x11   :  { %s1032_s26 = smov 0  }
  0x12 LB: > { %1303 = sst [smem:[#allocation15_spill]] %s922_s15  ;;  %s576_s27 = sadd.s32 4294967295, %s970_s26   ;;  %s970_s26 = sphi %s1032_s26, %s24_s26   ;;  %s966_s25 = sphi %s1030_s25, %s1353_s25   ;;  %s962_s24 = sphi %s1028_s24, %s1352_s24   ;;  %s958_s23 = sphi %s1026_s23, %s1342_s23   ;;  %s954_s22 = sphi %s1024_s22, %s1351_s22   ;;  %s950_s21 = sphi %s1022_s21, %s1350_s21   ;;  %s946_s0 = sphi %s1020_s0, %s1349_s0   ;;  %s942_s20 = sphi %s1018_s20, %s1348_s20   ;;  %s938_s19 = sphi %s1016_s19, %s1347_s19   ;;  %s934_s18 = sphi %s1014_s18, %s1340_s18   ;;  %s930_s17 = sphi %s1012_s17, %s1346_s17   ;;  %s926_s16 = sphi %s1010_s16, %s1345_s16   ;;  %s922_s15 = sphi %s1008_s15, %s1339_s15  }
  0x13   : > { %1304 = sst [smem:[#allocation16_spill]] %s926_s16  ;;  %s577_s28 = sadd.s32 4294967294, %s970_s26  }
  0x14   : > { %1305 = sst [smem:[#allocation17_spill]] %s938_s19  ;;  %p97_p0 = scmp.ne.s32.totalorder %s938_s19, %s934_s18 }
  0x15   : > { %1306 = sst [smem:[#allocation18_spill]] %s946_s0  ;;  %p1074_p1 = scmp.eq.s32.totalorder %s576_s27, 0 }
  0x16   : > { %1307 = sst [smem:[#allocation19_spill]] %s950_s21  ;;  %p124_p2 = scmp.ne.s32.totalorder %s930_s17, %s926_s16 }
  0x17   : > { %1308 = sst [smem:[#allocation20_spill]] %s954_s22  ;;  %p125_p3 = scmp.eq.s32.totalorder %s576_s27, 15 }
  0x18   : > { %1309 = sst [smem:[#allocation21_spill]] %s958_s23  ;;  %p1082_p4 = por %p1074_p1, %p97_p0 }
  0x19   : > { %p130_p5 = scmp.ne.s32.totalorder %s926_s16, %s922_s15  ;;  %p1088_p6 = por %p125_p3, %p124_p2 }
  0x1a   : > { %s1311_s30 = scalar_select %p1082_p4, 1, 0 }
  0x1b   : > { %s1313_s4 = scalar_select %p1088_p6, 1, 0 }
  0x1c   : > { %1312 = sst [smem:[#allocation22_spill]] %s1311_s30  ;;  %p131_p7 = scmp.eq.s32.totalorder %s577_s28, 15 }
  0x1d   : > { %1314 = sst [smem:[#allocation23_spill]] %s1313_s4  ;;  %p578_p8 = scmp.ge.s32.totalorder %s970_s26, 1 }
  0x1e   : > { %p138_p9 = scmp.lt.s32.totalorder %s970_s26, 17  ;;  %p1094_p10 = por %p131_p7, %p130_p5 }
  0x1f   : > { %s973_s7 = smov [#allocation5]  }
  0x20   : > { %s1315_s5 = scalar_select %p1094_p10, 1, 0 }
  0x21   : > { %p1098_p11 = pnand %p578_p8, %p138_p9  ;;  %s150_s8 = sshll.u32 %s973_s7, 4  ;;  %s151_s8 = int_to_ptr.vmem [resolvable:$true] %s150_s8 }
  0x22   : > { %1316 = sst [smem:[#allocation24_spill]] %s1315_s5  ;;  %s785_s9 = scalar_lea.vmem %s151_s8, 256 }
  0x23   : > { %p635_p12 = pneg %p1098_p11  ;;  %p786_p2 = scmp.ne.s32.totalorder %s151_s8, %s785_s9 }
  0x24   : > { %p793_p7 = scmp.lt.s32.totalorder %s151_s8, %s151_s8  ;;  %p794_p6 = scmp.lt.s32.totalorder %s785_s9, %s785_s9 }
  0x25   : > { %p636_p13 = pnand %p635_p12, %p1074_p1 }
  0x26   : > { %p795_p10 = por %p794_p6, %p793_p7 }
  0x27   : > { %p776_p0 = pneg %p636_p13 }
  0x29   : > { %p788_p3 = pnand %p786_p2, %p776_p0 }
  0x2b   : > { %p789_p5 = pneg %p788_p3 }
  0x2d   : > { %p796_p8 = pnand %p795_p10, %p789_p5 }
  0x2f   : > { %799 = shalt.err (!%p796_p8)
}
  0x30   : > { %s974_s10 = smov 128   ;;  %s975_s11 = smov 8  }
  0x31   : > { %s1318_s1 = sld [smem:[#allocation27_spill]]  ;;  %s39_s14 = sadd.s32 1, %s958_s23 }
  0x32   : > { %p40_p6 = scmp.ge.s32.totalorder %s39_s14, 4  ;;  %s46_s18 = sadd.s32 1, %s962_s24 }
  0x33   : > { %s50_s27 = sadd.s32 1, %s966_s25  ;;  %p91_p9 = scmp.ne.s32.totalorder %s942_s20, %s938_s19 }
  0x34   : > { %s1355_s14 = smov (%p40_p6, %s39_s14), 0  ;;  %s1357_s18 = smov (!%p40_p6, %s46_s18), %s962_s24 }
  0x35   : > { %1319 = sst [smem:[#allocation25_spill]] %s1355_s14  ;;  %s84_s28 = sadd.s32 1, %s942_s20 }
  0x36   : > { %p92_p10 = scmp.eq.s32.totalorder %s970_s26, 0  ;;  %p48_p12 = scmp.ge.s32.totalorder %s1357_s18, 2 }
  0x37   : > { %638 = dma.hbm_to_vmem [thread:$0]  (!%p636_p13), %s1318_s1, 256, %s151_s8, [#allocation6], %s974_s10, %s974_s10, %s975_s11  }
  0x38   : > { %s76_s7 = ssub.s32 %s958_s23, %s1355_s14  ;;  %p1121_p13 = por %p92_p10, %p91_p9 }
  0x39   : > { %s114_s9 = sadd.s32 1, %s930_s17  ;;  %s1359_s18 = smov (%p48_p12, %s1357_s18), 0 }
  0x3a   : > { %1321 = sst [smem:[#allocation26_spill]] %s1359_s18  ;;  %s1361_s27 = smov (!%p48_p12, %s50_s27), %s966_s25 }
  0x3b   : > { %p648_p0 = scmp.lt.s32.totalorder %s970_s26, 16  ;;  %s164_s10 = sand.u32 1, %s942_s20  }
  0x3c   : > { %p52_p2 = scmp.ge.s32.totalorder %s1361_s27, 2  ;;  %s78_s11 = ssub.s32 %s962_s24, %s1359_s18 }
  0x3d   : > { %s581_s12 = sshll.u32 %s164_s10, 3  ;;  %s582_s13 = sshll.u32 %s958_s23, 1 }
  0x3e   : > { %s1363_s27 = smov (%p52_p2, %s1361_s27), 0  ;;  %s174_s1 = sadd.s32 %s962_s24, %s582_s13 }
  0x3f   : > { %s75_s14 = ssub.s32 %s966_s25, %s1363_s27  ;;  %s583_s5 = sshll.u32 %s966_s25, 3 }
  0x40   : > { %s77_s15 = sor.u32 %s76_s7, %s75_s14  ;;  %s109_s3 = sor.u32 %s78_s11, %s75_s14 }
  0x41   : > { %s79_s4 = sor.u32 %s78_s11, %s77_s15  ;;  %p112_p3 = scmp.eq.s32.totalorder %s109_s3, 0 }
  0x42   : > { %p82_p5 = scmp.eq.s32.totalorder %s79_s4, 0  ;;  %s176_s22 = sadd.s32 %s583_s5, %s174_s1 }
  0x43   : > { %s1141_s21 = scalar_select %p112_p3, %s930_s17, %s114_s9  }
  0x44   : > { %s1144_s0 = scalar_select %p82_p5, %s942_s20, %s84_s28  }
  0x45   : > { %s584_s18 = sshll.u32 %s176_s22, 7  ;;  %s168_s23 = scalar_lea.vmem [#allocation8], %s581_s12 }
  0x46   : > { %s180_s16 = sshll.u32 %s168_s23, 4  ;;  %s178_s13 = scalar_lea.hbm %s1284_s2, %s584_s18  ;;  %s181_s16 = int_to_ptr.vmem [resolvable:$true] %s180_s16 }
  0x47   : > { %p1153_p7 = pnand %p648_p0, %p1121_p13  ;;  %s165_s1 = scalar_lea.sflag [#allocation9], %s164_s10 }
  0x48   : > { %s813_s3 = scalar_lea.vmem %s181_s16, 128  ;;  %s976_s15 = smov [#allocation8]  }
  0x49   : > { %p802_p8 = pneg %p1153_p7  ;;  %p814_p6 = scmp.ne.s32.totalorder %s181_s16, %s813_s3 }
  0x4a   : > { %s818_s22 = sshll.u32 %s976_s15, 4  ;;  %s819_s22 = int_to_ptr.vmem [resolvable:$false] %s818_s22 }
  0x4b   : > { %p816_p9 = pnand %p814_p6, %p802_p8  ;;  %s820_s19 = scalar_lea.vmem %s819_s22, 256 }
  0x4c   : > { %p821_p12 = scmp.lt.s32.totalorder %s181_s16, %s819_s22  ;;  %p822_p2 = scmp.lt.s32.totalorder %s820_s19, %s813_s3 }
  0x4d   : > { %p817_p10 = pneg %p816_p9 }
  0x4e   : > { %p823_p3 = por %p822_p2, %p821_p12 }
  0x50   : > { %p824_p5 = pnand %p823_p3, %p817_p10 }
  0x52   : > { %827 = shalt.err (!%p824_p5)
}
  0x53   : > { %642 = dma.hbm_to_vmem [thread:$0]  (!%p1153_p7), %s178_s13, 128, %s181_s16, %s165_s1  }
  0x54   : > { %189 = sbr.rel (%p1098_p11) target bundleno = 583 (0x247), region = 28 }
  0x59   : > { %909 = dma.done.wait (%p1074_p1), [#allocation6], 256  }
  0x5a   : > { %911 = vsyncadd (%p1074_p1), [#allocation6], 4294967040  ;;  %s1323_s23 = sld [smem:[#allocation17_spill]] }
  0x60   : > { %s195_s4 = sand.u32 1, %s1323_s23  }
  0x61   : > { %s587_s5 = sshll.u32 %s195_s4, 3  ;;  %s196_s18 = scalar_lea.sflag [#allocation9], %s195_s4 }
  0x62   : > { %s199_s28 = scalar_lea.vmem [#allocation8], %s587_s5 }
  0x63   : > { %913 = dma.done.wait (%p1082_p4), %s196_s18, 128  }
  0x64   : > { %915 = vsyncadd (%p1082_p4), %s196_s18, 4294967168  ;;  %s1325_s16 = sld [smem:[#allocation16_spill]] }
  0x65   : > { %s1326_s29 = sld [smem:[#allocation18_spill]] }
  0x6a   : > { %s217_s6 = sand.u32 1, %s1325_s16  }
  0x6b   : > { %s588_s7 = sshll.u32 %s217_s6, 5  ;;  %p589_p1 = scmp.ne.s32.totalorder %s1326_s29, 0 }
  0x6c   : > { %s1175_s8 = scalar_lea.vmem [#allocation10], %s588_s7 }
  0x6d   : > { %223 = sbr.rel (%p589_p1) target bundleno = 117 (0x75), region = 40 }
  0x72   : > { %vm224_vm0 = vcmask 64512   ;;  %v977_v0 = vmov 0.0  }
  0x73   : > { %225 = vst.msk [vmem:[#allocation2] sm:$0xff] %vm224_vm0, %v977_v0  ;;  %226 = vst.msk [vmem:[#allocation2 + $0x8] sm:$0xff] %vm224_vm0, %v977_v0 }
  0x74   : > { %227 = vst.msk [vmem:[#allocation2 + $0x10] sm:$0xff] %vm224_vm0, %v977_v0  ;;  %228 = vst.msk [vmem:[#allocation2 + $0x18] sm:$0xff] %vm224_vm0, %v977_v0 }
  0x75 PF: > { %v325_v1 = vld [vmem:[%s199_s28] sm:$0xff]  ;;  %v230_v2 = vld [vmem:[#allocation5 + $0x8] sm:$0xff]  ;;  %s978_s9 = smov 112   ;;  %v979_v3 = vmov 0.0   ;;  %s1327_s10 = sld [smem:[#allocation18_spill]]  ;;  %v229_v4 = vld [vmem:[#allocation5] sm:$0xff] }
  0x76   : > { %327 = vrot.lane.b32.xlu0 %v325_v1, %s978_s9  ;;  %613 = vmatprep.subr.mxu0 %v979_v3  ;;  %vm980_vm1 = vmmov 0   ;;  %vm232_vm2 = vcmask 130048   ;;  %vm312_vm3 = vcmask 64512   ;;  %s981_s1 = smov 120  }
  0x77   : > { %614 = vmatpush3.msra.mxu0 %v230_v2  ;;  %617 = vmatprep.mubr.msk.f32.mxu0 %vm980_vm1, %v979_v3 }
  0x78   : > { %615 = vmatprep.subr.mxu0 %v979_v3  ;;  %620 = vmatprep.subr.mxu1 %v979_v3 }
  0x79   : > { %616 = vmatpush3.msra.mxu0 %v229_v4  ;;  %621 = vmatpush3.msra.mxu1 %v230_v2 }
  0x7a   : > { %618 = vmatmul.mubr.msk.f32.vlgmr.msra.gmra.mxu0 %vm232_vm2, %v325_v1  ;;  %622 = vmatprep.subr.mxu1 %v979_v3 }
  0x7b   : > { %623 = vmatpush3.msra.mxu1 %v229_v4  ;;  %624 = vmatprep.mubr.msk.f32.mxu1 %vm980_vm1, %v979_v3  ;;  %s1179_s11 = sshll.u32 %s1327_s10, 7  ;;  %p597_p4 = scmp.ne.s32.totalorder %s1327_s10, 3 }
  0x7c   : > { %s307_s12 = sld [smem:[#allocation4 + %s1179_s11]]  ;;  %s314_s3 = sadd.s32 1, %s1179_s11 }
  0x7d   : > { %s315_s15 = sld [smem:[#allocation4 + %s314_s3]]  ;;  %s401_s22 = sadd.s32 2, %s1179_s11 }
  0x7e   : > { %s402_s23 = sld [smem:[#allocation4 + %s401_s22]]  ;;  %s408_s18 = sadd.s32 3, %s1179_s11 }
  0x7f   : > { %s409_s28 = sld [smem:[#allocation4 + %s408_s18]] }
  0x82   : > { %s592_s13 = sshll.u32 %s307_s12, 3 }
  0x83   : > { %s309_s14 = scalar_lea.vmem [#allocation2], %s592_s13  ;;  %s593_s19 = sshll.u32 %s315_s15, 3 }
  0x84   : > { %v310_v6 = vld [vmem:[%s309_s14] sm:$0xff]  ;;  %s317_s30 = scalar_lea.vmem [#allocation2], %s593_s19  ;;  %s595_s4 = sshll.u32 %s402_s23, 3 }
  0x85   : > { %s404_s5 = scalar_lea.vmem [#allocation2], %s595_s4  ;;  %s596_s16 = sshll.u32 %s409_s28, 3 }
  0x86   : > { %s411_s7 = scalar_lea.vmem [#allocation2], %s596_s16 }
  0xe8   : > { %v328_v5 = vpop.permute.xlu0 %327 }
  0xe9   : > { %625 = vmatmul.mubr.msk.f32.vlgmr.msra.gmra.mxu1 %vm232_vm2, %v328_v5 }
 0x13a   : > { %v302_v7 = vpop.f32.mrf.mxu0 }
 0x13b   : > { %v311_v8 = vadd.f32 %v310_v6, %v302_v7  ;;  %320 = vrot.lane.b32.xlu0 %v302_v7, %s981_s1 }
 0x13c   : > { %v619_v9 = vpop.f32.mrf.mxu0 }
 0x13d   : > { %313 = vst.msk [vmem:[%s309_s14] sm:$0xff] %vm312_vm3, %v311_v8 }
 0x144   : > { %v318_v13 = vld [vmem:[%s317_s30] sm:$0xff] }
 0x1a9   : > { %v397_v10 = vpop.f32.mrf.mxu1 }
 0x1aa   : > { %414 = vrot.lane.b32.xlu1 %v397_v10, %s981_s1 }
 0x1ab   : > { %v626_v11 = vpop.f32.mrf.mxu1 }
 0x1ad   : > { %v321_v12 = vpop.permute.xlu0 %320 }
 0x1ae   : > { %v323_v14 = vadd.f32 %v321_v12, %v318_v13 }
 0x1b0   : > { %324 = vst.msk [vmem:[%s317_s30] sm:$0xff] %vm312_vm3, %v323_v14 }
 0x1b7   : > { %v405_v15 = vld [vmem:[%s404_s5] sm:$0xff] }
 0x1b8   : > { %v406_v16 = vadd.f32 %v405_v15, %v397_v10 }
 0x1ba   : > { %407 = vst.msk [vmem:[%s404_s5] sm:$0xff] %vm312_vm3, %v406_v16 }
 0x1c1   : > { %v412_v18 = vld [vmem:[%s411_s7] sm:$0xff] }
 0x21b   : > { %422 = sbr.rel (%p597_p4) target bundleno = 553 (0x229), region = 44 }
 0x21c   : > { %v415_v17 = vpop.permute.xlu1 %414 }
 0x21d   : > { %v417_v19 = vadd.f32 %v415_v17, %v412_v18 }
 0x21f   : > { %418 = vst.msk [vmem:[%s411_s7] sm:$0xff] %vm312_vm3, %v417_v19 }
 0x226   : > { %v423_v20 = vld [vmem:[#allocation2] sm:$0xff]  ;;  %v426_v21 = vld [vmem:[#allocation2 + $0x8] sm:$0xff]  ;;  %v430_v22 = vld [vmem:[#allocation2 + $0x10] sm:$0xff] }
 0x227   : > { %424 = vst.msk [vmem:[%s1175_s8] sm:$0xff] %vm312_vm3, %v423_v20  ;;  %598 = vst.msk [vmem:[%s1175_s8 + $0x8] sm:$0xff] %vm312_vm3, %v426_v21  ;;  %v434_v23 = vld [vmem:[#allocation2 + $0x18] sm:$0xff] }
 0x228   : > { %599 = vst.msk [vmem:[%s1175_s8 + $0x10] sm:$0xff] %vm312_vm3, %v430_v22  ;;  %600 = vst.msk [vmem:[%s1175_s8 + $0x18] sm:$0xff] %vm312_vm3, %v434_v23 }
 0x229 PF: > { %s1328_s29 = sld [smem:[#allocation19_spill]]  ;;  %s454_s14 = sshll.u32 %s1175_s8, 4  ;;  %s1201_s14 = int_to_ptr.vmem [resolvable:$true] %s454_s14 }
 0x22a   : > { %s1329_s9 = sld [smem:[#allocation20_spill]]  ;;  %s1210_s4 = scalar_lea.sflag [#allocation7], %s217_s6 }
 0x22b   : > { %s1331_s11 = sld [smem:[#allocation23_spill]]  ;;  %s828_s5 = scalar_lea.vmem %s1201_s14, 512 }
 0x22c   : > { %s1332_s19 = sld [smem:[#allocation28_spill]]  ;;  %p829_p11 = scmp.ne.s32.totalorder %s1201_s14, %s828_s5 }
 0x22d   : > { %s982_s8 = smov [#allocation10]  }
 0x22e   : > { %s832_s18 = sshll.u32 %s982_s8, 4  ;;  %s833_s18 = int_to_ptr.vmem [resolvable:$false] %s832_s18 }
 0x22f   : > { %s602_s12 = sshll.u32 %s1328_s29, 2  ;;  %s834_s28 = scalar_lea.vmem %s833_s18, 1024 }
 0x230   : > { %s603_s13 = sshll.u32 %s1329_s9, 3  ;;  %p835_p8 = scmp.lt.s32.totalorder %s1201_s14, %s833_s18 }
 0x231   : > { %s451_s1 = sadd.s32 %s603_s13, %s602_s12  ;;  %p1334_p13 = scmp.ne.s32.totalorder %s1331_s11, 0 }
 0x232   : > { %s604_s3 = sshll.u32 %s451_s1, 7  ;;  %s1333_s30 = smov %s1332_s19 }
 0x233   : > { %s1206_s23 = scalar_lea.hbm %s1332_s19, %s604_s3  ;;  %p830_p0 = pnand %p829_p11, %p1334_p13 }
 0x234   : > { %p836_p6 = scmp.lt.s32.totalorder %s834_s28, %s828_s5 }
 0x235   : > { %p831_p7 = pneg %p830_p0 }
 0x236   : > { %p837_p9 = por %p836_p6, %p835_p8 }
 0x238   : > { %p838_p10 = pnand %p837_p9, %p831_p7 }
 0x23a   : > { %841 = shalt.err (!%p838_p10)
}
 0x23b   : > { %s842_s6 = scalar_lea.hbm %s1206_s23, 512  ;;  %s846_s29 = scalar_lea.hbm %s1333_s30, 2048 }
 0x23c   : > { %p843_p12 = scmp.ne.s32.totalorder %s1206_s23, %s842_s6  ;;  %p847_p5 = scmp.lt.s32.totalorder %s1206_s23, %s1333_s30 }
 0x23d   : > { %p848_p1 = scmp.lt.s32.totalorder %s846_s29, %s842_s6 }
 0x23e   : > { %p844_p2 = pnand %p843_p12, %p1334_p13 }
 0x23f   : > { %p849_p4 = por %p848_p1, %p847_p5 }
 0x240   : > { %p845_p3 = pneg %p844_p2 }
 0x242   : > { %p850_p11 = pnand %p849_p4, %p845_p3 }
 0x244   : > { %853 = shalt.err (!%p850_p11)
}
 0x245   : > { %s983_s12 = smov 128   ;;  %s984_s13 = smov 8  }
 0x246   : > { %633 = dma.vmem_to_hbm [thread:$0]  (%p1334_p13), %s1201_s14, 512, %s1206_s23, %s1210_s4, %s983_s12, %s983_s12, %s984_s13  }
 0x247 PF: > { %s1335_s1 = sld [smem:[#allocation15_spill]]  ;;  %p650_p0 = scmp.ge.s32.totalorder %s970_s26, 2 }
 0x248   : > { %s1336_s3 = sld [smem:[#allocation24_spill]] }
 0x24d   : > { %s469_s15 = sand.u32 1, %s1335_s1  }
 0x24e   : > { %p1337_p7 = scmp.ne.s32.totalorder %s1336_s3, 0  ;;  %s470_s22 = scalar_lea.sflag [#allocation7], %s469_s15 }
 0x250   : > { %p644_p8 = pnand %p650_p0, %p1337_p7 }
 0x252   : > { %p645_p6 = pneg %p644_p8 }
 0x254   : > { %917 = dma.done.wait (%p645_p6), %s470_s22, 512  }
 0x255   : > { %919 = vsyncadd (%p645_p6), %s470_s22, 4294966784  ;;  %s24_s26 = sadd.s32 1, %s970_s26   ;;  %s1339_s15 = sld [smem:[#allocation16_spill]] }
 0x256   : > { %p1238_p9 = scmp.ge.s32.totalorder %s24_s26, 18   ;;  %s1340_s18 = sld [smem:[#allocation17_spill]] }
 0x257   : > { %s1341_s11 = sld [smem:[#allocation21_spill]]  ;;  %s1345_s16 = smov %s930_s17 }
 0x258   : > { %s1342_s23 = sld [smem:[#allocation25_spill]]  ;;  %s1346_s17 = smov %s1141_s21 }
 0x259   : > { %s1343_s14 = sld [smem:[#allocation26_spill]]  ;;  %s1347_s19 = smov %s942_s20 }
 0x25a   : > { %s1348_s20 = smov %s1144_s0  ;;  %s1350_s21 = smov %s962_s24 }
 0x25b   : > { %s1351_s22 = smov %s966_s25  ;;  %s1353_s25 = smov %s1363_s27 }
 0x25c   :  { %23 = sbr.rel (!%p1238_p9) target bundleno = 18 (0x12), region = 96 }
 0x25d   : > { %s1349_s0 = smov %s1341_s11 }
 0x25f   : > { %s1352_s24 = smov %s1343_s14 }
 0x261   :  { %475 = vsyncpa [#allocation6], 1 }
 0x262   :  { %477 = vsyncpa [#allocation6 + $0x1], 1 }
 0x263   :  { %478 = vsyncpa [#allocation9], 1 }
 0x264   :  { %480 = vsyncpa [#allocation9 + $0x1], 1 }
 0x265   :  { %481 = vsyncpa [#allocation7], 1 }
 0x266   :  { %483 = vsyncpa [#allocation7 + $0x1], 1 }

</bundles_post_ra>
